<compile_context>
chip_gen: v7x
topology: tpu7x:2x2x1
jax: 0.10.0
libtpu: 0.0.40
codegen_flags: <defaults>
</compile_context>

<pallas_src>
import math
import jax
import jax.numpy as jnp
from jax.experimental import pallas as pl
from jax.experimental.pallas import tpu as pltpu


def gru_fc_fused_kernel(restart_ref,   # SMEM (1,)   int32  restart flag
                        x_ref,         # VMEM (T*B, F)  f32  flattened inputs
                        h0_ref,        # VMEM (B, H)    f32  previous hidden
                        w_ih_ref,      # VMEM (F, 3H)   bf16 W_ih^T   gates r,z,n
                        w_hh_ref,      # VMEM (H, 3H)   bf16 W_hh^T   gates r,z,n
                        b_gates_ref,   # VMEM (1, 3H)   f32  [b_i+b_h (r,z), b_i (n)]
                        b_hn_ref,      # VMEM (1, H)    f32  b_hh (n gate)
                        w_fc_ref,      # VMEM (H, C)    bf16 W_fc^T
                        b_fc_ref,      # VMEM (1, C)    f32  b_fc
                        h_seq_ref,     # VMEM (T*B, H)  f32  per-step hidden out
                        logits_ref,    # VMEM (T*B, C)  f32  per-step logits out
                        h_n_ref):      # VMEM (B, H)    f32  final hidden out
    TB, F = x_ref.shape
    B, H = h0_ref.shape
    T = TB // B

    # ---- Hoisted loads / broadcasts (outside the serial recurrence) --------
    w_hh = w_hh_ref[...]                                    # (H, 3H) bf16
    w_fc = w_fc_ref[...]                                    # (H, C)  bf16
    b_hn = jnp.broadcast_to(b_hn_ref[...], (B, H))          # one broadcast, reused T times

    # ---- Hoisted input projection: one MXU pass for all T steps -----------
    # gx_all[:, 0:2H] already includes b_ih+b_hh; gx_all[:, 2H:3H] only b_ih.
    gx_all = jnp.dot(x_ref[...].astype(jnp.bfloat16), w_ih_ref[...],
                     preferred_element_type=jnp.float32) + b_gates_ref[...]

    # restart=1 -> zero initial hidden (done in-kernel, same compiled kernel).
    keep = (1 - restart_ref[0]).astype(jnp.float32)
    h = h0_ref[...] * keep                                   # (B, H) f32

    # ---- Time recurrence: fully unrolled, only h @ W_hh^T on the chain ----
    hs = []
    for t in range(T):
        gx = gx_all[t * B:(t + 1) * B, :]                    # (B, 3H) static slice
        gh = jnp.dot(h.astype(jnp.bfloat16), w_hh,
                     preferred_element_type=jnp.float32)     # (B, 3H)
        r = jax.nn.sigmoid(gx[:, 0:H] + gh[:, 0:H])
        z = jax.nn.sigmoid(gx[:, H:2 * H] + gh[:, H:2 * H])
        n = jnp.tanh(gx[:, 2 * H:3 * H] + r * (gh[:, 2 * H:3 * H] + b_hn))
        h = (1.0 - z) * n + z * h
        hs.append(h)

    h_all = jnp.concatenate(hs, axis=0)                      # (T*B, H) f32

    # ---- Outputs -----------------------------------------------------------
    h_seq_ref[...] = h_all.astype(h_seq_ref.dtype)
    h_n_ref[...] = h.astype(h_n_ref.dtype)
    # Batched classification head: one (T*B, H) x (H, C) matmul + one bias add.
    logits_ref[...] = (jnp.dot(h_all.astype(jnp.bfloat16), w_fc,
                               preferred_element_type=jnp.float32)
                       + b_fc_ref[...]).astype(logits_ref.dtype)


def full_layer_forward_seq(x_seq, h_prev, params, *, restart=False):
    """Run T GRU+FC steps in ONE no-grid pallas_call (everything VMEM-resident).

    x_seq  : (T, B, F)
    h_prev : (1, B, H) previous hidden, or None (=> zero init regardless of
             `restart` — matches how Full_layer is used in ActorCritic).
    returns (out_seq (T,B,H), logits_seq (T,B,C), h_n (1,B,H))
    """
    T, B, F = x_seq.shape
    H = params["w_hh_t"].shape[0]
    C = params["w_fc_t"].shape[1]

    use_restart = bool(restart) or (h_prev is None)
    restart_flag = jnp.asarray([1 if use_restart else 0], dtype=jnp.int32)
    h0 = (jnp.zeros((B, H), jnp.float32) if h_prev is None
          else h_prev.reshape(B, H).astype(jnp.float32))

    x_flat = x_seq.reshape(T * B, F).astype(jnp.float32)

    vmem = pl.BlockSpec(memory_space=pltpu.MemorySpace.VMEM)
    smem = pl.BlockSpec(memory_space=pltpu.MemorySpace.SMEM)

    h_all, logits_all, h_n = pl.pallas_call(
        gru_fc_fused_kernel,
        out_shape=(jax.ShapeDtypeStruct((T * B, H), jnp.float32),
                   jax.ShapeDtypeStruct((T * B, C), jnp.float32),
                   jax.ShapeDtypeStruct((B, H), jnp.float32)),
        in_specs=[smem, vmem, vmem, vmem, vmem, vmem, vmem, vmem, vmem],
        out_specs=(vmem, vmem, vmem),
    )(restart_flag, x_flat, h0,
      params["w_ih_bf16"], params["w_hh_bf16"],
      params["b_gates"], params["b_hn"],
      params["w_fc_bf16"], params["b_fc_row"])

    return (h_all.reshape(T, B, H),
            logits_all.reshape(T, B, C),
            h_n.reshape(1, B, H))


def full_layer_forward(x, h_prev, params, *, restart=False):
    """Single-step Full_layer.forward (fc_rnn='gru', fc_num=1).

    x : (B, F); returns (output (1,B,H), logits (1,B,C), h_n (1,B,H)).
    """
    return full_layer_forward_seq(x[None], h_prev, params, restart=restart)


def init_params(key, feature_num, hidden_state_dim, class_num):
    """Deterministic init mirroring torch.nn.GRU / nn.Linear shapes."""
    H = hidden_state_dim
    kih, khh, kbi, kbh, kfw, kfb = jax.random.split(key, 6)
    k = 1.0 / math.sqrt(H)

    # torch GRU: weight_ih_l0 (3H, F), weight_hh_l0 (3H, H); gates [r, z, n].
    w_ih = jax.random.uniform(kih, (3 * H, feature_num), jnp.float32, -k, k)
    w_hh = jax.random.uniform(khh, (3 * H, H), jnp.float32, -k, k)
    b_ih = jax.random.uniform(kbi, (3 * H,), jnp.float32, -k, k)
    b_hh = jax.random.uniform(kbh, (3 * H,), jnp.float32, -k, k)
    # torch Linear: weight (C, H), bias (C,).
    w_fc = jax.random.uniform(kfw, (class_num, H), jnp.float32, -k, k)
    b_fc = jax.random.uniform(kfb, (class_num,), jnp.float32, -k, k)

    w_ih_t = w_ih.T          # (F, 3H)
    w_hh_t = w_hh.T          # (H, 3H)
    w_fc_t = w_fc.T          # (H, C)

    # Bias added once in the hoisted gx precompute: full b_ih everywhere,
    # plus b_hh for the r/z gates only (b_hh of the n gate goes inside tanh).
    b_gates = jnp.concatenate(
        [b_ih[:2 * H] + b_hh[:2 * H], b_ih[2 * H:]]).reshape(1, -1)

    return {
        # f32 copies (reference / shape inference)
        "w_ih_t": w_ih_t, "w_hh_t": w_hh_t,
        "b_ih": b_ih.reshape(1, -1), "b_hh": b_hh.reshape(1, -1),
        "w_fc_t": w_fc_t, "b_fc": b_fc.reshape(1, -1),
        # kernel-side packed / bf16 parameters
        "w_ih_bf16": w_ih_t.astype(jnp.bfloat16),          # (F, 3H)
        "w_hh_bf16": w_hh_t.astype(jnp.bfloat16),          # (H, 3H)
        "w_fc_bf16": w_fc_t.astype(jnp.bfloat16),          # (H, C)
        "b_gates": b_gates,                                 # (1, 3H)
        "b_hn": b_hh[2 * H:3 * H].reshape(1, -1),           # (1, H)
        "b_fc_row": b_fc.reshape(1, -1),                    # (1, C)
    }


def reference_forward_seq(x_seq, h_prev, params, *, restart=False):
    """Pure-JAX f32 reference of T sequential GRU steps + Linear head."""
    T, B, F = x_seq.shape
    H = params["w_hh_t"].shape[0]
    h = (jnp.zeros((B, H), jnp.float32) if (restart or h_prev is None)
         else h_prev.reshape(B, H))
    outs, logits = [], []
    for t in range(T):
        gx = x_seq[t] @ params["w_ih_t"] + params["b_ih"]
        gh = h @ params["w_hh_t"] + params["b_hh"]
        r = jax.nn.sigmoid(gx[:, :H] + gh[:, :H])
        z = jax.nn.sigmoid(gx[:, H:2 * H] + gh[:, H:2 * H])
        n = jnp.tanh(gx[:, 2 * H:] + r * gh[:, 2 * H:])
        h = (1.0 - z) * n + z * h
        outs.append(h)
        logits.append(h @ params["w_fc_t"] + params["b_fc"])
    return jnp.stack(outs), jnp.stack(logits), h[None]


if __name__ == "__main__":
    # Small, tile-friendly shapes consistent with the module's forward.
    batch_size = 8
    feature_num = 128
    hidden_state_dim = 128
    class_num = 128
    T = 4

    key = jax.random.PRNGKey(0)
    kp, kx = jax.random.split(key)
    params = init_params(kp, feature_num, hidden_state_dim, class_num)
    x_seq = jax.random.normal(kx, (T, batch_size, feature_num), jnp.float32)

    # Single-step semantics (as Full_layer.forward is called in act()):
    out1, logits1, h1 = full_layer_forward(x_seq[0], None, params, restart=True)
    out2, logits2, h2 = full_layer_forward(x_seq[1], h1, params, restart=False)

    # Fused multi-step call: T steps, one pallas_call, everything VMEM-resident.
    out_seq, logits_seq, h_last = full_layer_forward_seq(
        x_seq, None, params, restart=True)

    jax.block_until_ready((out1, logits1, h1, out2, logits2, h2,
                           out_seq, logits_seq, h_last))

    # Correctness vs. pure-JAX f32 reference (bf16 weights => relaxed atol).
    atol = 3e-2
    r_out1, r_log1, r_h1 = reference_forward_seq(x_seq[:1], None, params, restart=True)
    r_out2, r_log2, r_h2 = reference_forward_seq(x_seq[1:2], r_h1, params, restart=False)
    r_out_all, r_log_all, r_h_all = reference_forward_seq(x_seq, None, params, restart=True)

    assert jnp.allclose(out1, r_out1, atol=atol), "hidden mismatch (step 1)"
    assert jnp.allclose(logits1, r_log1, atol=atol), "logits mismatch (step 1)"
    assert jnp.allclose(h1, r_h1, atol=atol), "h_n mismatch (step 1)"
    assert jnp.allclose(out2, r_out2, atol=atol), "hidden mismatch (step 2)"
    assert jnp.allclose(logits2, r_log2, atol=atol), "logits mismatch (step 2)"
    assert jnp.allclose(out_seq, r_out_all, atol=atol), "hidden mismatch (seq)"
    assert jnp.allclose(logits_seq, r_log_all, atol=atol), "logits mismatch (seq)"
    assert jnp.allclose(h_last, r_h_all, atol=atol), "h_n mismatch (seq)"

    assert out2.shape == (1, batch_size, hidden_state_dim)
    assert logits2.shape == (1, batch_size, class_num)
    assert out_seq.shape == (T, batch_size, hidden_state_dim)
    assert logits_seq.shape == (T, batch_size, class_num)
    assert h_last.shape == (1, batch_size, hidden_state_dim)

    # TODO(synk): fc_num>1 (per-step Linear heads), lstm/transformer/nfc
    # branches, and the actor/critic BatchNorm+Linear+Softmax heads plus
    # Categorical sampling of ActorCritic.act are outside this kernel's scope.
    print("KERNEL_OK")
</pallas_src>

<mosaic_0001>
module attributes {stable_mosaic.version = 11 : i64} {
  func.func @gru_fc_fused_kernel(%arg0: memref<1xi32, #tpu.memory_space<smem>>, %arg1: memref<8x128xf32, #tpu.memory_space<vmem>>, %arg2: memref<8x128xf32, #tpu.memory_space<vmem>>, %arg3: memref<128x384xbf16, #tpu.memory_space<vmem>>, %arg4: memref<128x384xbf16, #tpu.memory_space<vmem>>, %arg5: memref<1x384xf32, #tpu.memory_space<vmem>>, %arg6: memref<1x128xf32, #tpu.memory_space<vmem>>, %arg7: memref<128x128xbf16, #tpu.memory_space<vmem>>, %arg8: memref<1x128xf32, #tpu.memory_space<vmem>>, %arg9: memref<8x128xf32, #tpu.memory_space<vmem>>, %arg10: memref<8x128xf32, #tpu.memory_space<vmem>>, %arg11: memref<8x128xf32, #tpu.memory_space<vmem>>) attributes {dimension_semantics = [], scalar_prefetch = 0 : i64, scratch_operands = 0 : i64, tpu.core_type = #tpu.core_type<tc>} {
    %c0 = arith.constant 0 : index
    %c0_0 = arith.constant 0 : index
    %0 = vector.load %arg4[%c0, %c0_0] : memref<128x384xbf16, #tpu.memory_space<vmem>>, vector<128x384xbf16>
    %c0_1 = arith.constant 0 : index
    %c0_2 = arith.constant 0 : index
    %1 = vector.load %arg7[%c0_1, %c0_2] : memref<128x128xbf16, #tpu.memory_space<vmem>>, vector<128x128xbf16>
    %c0_3 = arith.constant 0 : index
    %c0_4 = arith.constant 0 : index
    %2 = vector.load %arg6[%c0_3, %c0_4] : memref<1x128xf32, #tpu.memory_space<vmem>>, vector<1x128xf32>
    %3 = vector.shape_cast %2 : vector<1x128xf32> to vector<1x128xf32>
    %4 = vector.broadcast %3 : vector<1x128xf32> to vector<8x128xf32>
    %c0_5 = arith.constant 0 : index
    %c0_6 = arith.constant 0 : index
    %5 = vector.load %arg1[%c0_5, %c0_6] : memref<8x128xf32, #tpu.memory_space<vmem>>, vector<8x128xf32>
    %6 = arith.truncf %5 : vector<8x128xf32> to vector<8x128xbf16>
    %c0_7 = arith.constant 0 : index
    %c0_8 = arith.constant 0 : index
    %7 = vector.load %arg3[%c0_7, %c0_8] : memref<128x384xbf16, #tpu.memory_space<vmem>>, vector<128x384xbf16>
    %cst = arith.constant dense<0.000000e+00> : vector<8x384xf32>
    %8 = tpu.matmul %6, %7, %cst {dimension_numbers = #tpu.dot_dimension_numbers<[1], [0], [0], [1], [0, 0, 1, 1], [], []>} : vector<8x128xbf16>, vector<128x384xbf16>, vector<8x384xf32> -> vector<8x384xf32>
    %c0_9 = arith.constant 0 : index
    %c0_10 = arith.constant 0 : index
    %9 = vector.load %arg5[%c0_9, %c0_10] : memref<1x384xf32, #tpu.memory_space<vmem>>, vector<1x384xf32>
    %10 = vector.broadcast %9 : vector<1x384xf32> to vector<8x384xf32>
    %11 = arith.addf %8, %10 : vector<8x384xf32>
    %c0_11 = arith.constant 0 : index
    %12 = memref.load %arg0[%c0_11] : memref<1xi32, #tpu.memory_space<smem>>
    %c1_i32 = arith.constant 1 : i32
    %13 = arith.subi %c1_i32, %12 : i32
    %14 = arith.sitofp %13 : i32 to f32
    %c0_12 = arith.constant 0 : index
    %c0_13 = arith.constant 0 : index
    %15 = vector.load %arg2[%c0_12, %c0_13] : memref<8x128xf32, #tpu.memory_space<vmem>>, vector<8x128xf32>
    %16 = vector.broadcast %14 : f32 to vector<8x128xf32>
    %17 = arith.mulf %15, %16 : vector<8x128xf32>
    %18 = arith.truncf %17 : vector<8x128xf32> to vector<8x128xbf16>
    %cst_14 = arith.constant dense<0.000000e+00> : vector<8x384xf32>
    %19 = tpu.matmul %18, %0, %cst_14 {dimension_numbers = #tpu.dot_dimension_numbers<[1], [0], [0], [1], [0, 0, 1, 1], [], []>} : vector<8x128xbf16>, vector<128x384xbf16>, vector<8x384xf32> -> vector<8x384xf32>
    %20 = vector.extract_strided_slice %11 {offsets = [0, 0], sizes = [8, 128], strides = [1, 1]} : vector<8x384xf32> to vector<8x128xf32>
    %21 = vector.extract_strided_slice %19 {offsets = [0, 0], sizes = [8, 128], strides = [1, 1]} : vector<8x384xf32> to vector<8x128xf32>
    %22 = arith.addf %20, %21 : vector<8x128xf32>
    %23 = arith.negf %22 : vector<8x128xf32>
    %24 = math.exp %23 : vector<8x128xf32>
    %cst_15 = arith.constant 1.000000e+00 : f32
    %25 = vector.broadcast %cst_15 : f32 to vector<8x128xf32>
    %26 = arith.addf %25, %24 : vector<8x128xf32>
    %27 = arith.divf %25, %26 : vector<8x128xf32>
    %28 = vector.extract_strided_slice %11 {offsets = [0, 128], sizes = [8, 128], strides = [1, 1]} : vector<8x384xf32> to vector<8x128xf32>
    %29 = vector.extract_strided_slice %19 {offsets = [0, 128], sizes = [8, 128], strides = [1, 1]} : vector<8x384xf32> to vector<8x128xf32>
    %30 = arith.addf %28, %29 : vector<8x128xf32>
    %31 = arith.negf %30 : vector<8x128xf32>
    %32 = math.exp %31 : vector<8x128xf32>
    %cst_16 = arith.constant 1.000000e+00 : f32
    %33 = vector.broadcast %cst_16 : f32 to vector<8x128xf32>
    %34 = arith.addf %33, %32 : vector<8x128xf32>
    %35 = arith.divf %33, %34 : vector<8x128xf32>
    %36 = vector.extract_strided_slice %11 {offsets = [0, 256], sizes = [8, 128], strides = [1, 1]} : vector<8x384xf32> to vector<8x128xf32>
    %37 = vector.extract_strided_slice %19 {offsets = [0, 256], sizes = [8, 128], strides = [1, 1]} : vector<8x384xf32> to vector<8x128xf32>
    %38 = arith.addf %37, %4 : vector<8x128xf32>
    %39 = arith.mulf %27, %38 : vector<8x128xf32>
    %40 = arith.addf %36, %39 : vector<8x128xf32>
    %41 = math.tanh %40 : vector<8x128xf32>
    %cst_17 = arith.constant 1.000000e+00 : f32
    %42 = vector.broadcast %cst_17 : f32 to vector<8x128xf32>
    %43 = arith.subf %42, %35 : vector<8x128xf32>
    %44 = arith.mulf %43, %41 : vector<8x128xf32>
    %45 = arith.mulf %35, %17 : vector<8x128xf32>
    %46 = arith.addf %44, %45 : vector<8x128xf32>
    %c0_18 = arith.constant 0 : index
    %c0_19 = arith.constant 0 : index
    %47 = vector.load %arg9[%c0_18, %c0_19] : memref<8x128xf32, #tpu.memory_space<vmem>>, vector<8x128xf32>
    tpu.vector_store %arg9[%c0_18, %c0_19], %46 {strides = array<i32>} : memref<8x128xf32, #tpu.memory_space<vmem>>, vector<8x128xf32>,
    %c0_20 = arith.constant 0 : index
    %c0_21 = arith.constant 0 : index
    %48 = vector.load %arg11[%c0_20, %c0_21] : memref<8x128xf32, #tpu.memory_space<vmem>>, vector<8x128xf32>
    tpu.vector_store %arg11[%c0_20, %c0_21], %46 {strides = array<i32>} : memref<8x128xf32, #tpu.memory_space<vmem>>, vector<8x128xf32>,
    %49 = arith.truncf %46 : vector<8x128xf32> to vector<8x128xbf16>
    %cst_22 = arith.constant dense<0.000000e+00> : vector<8x128xf32>
    %50 = tpu.matmul %49, %1, %cst_22 {dimension_numbers = #tpu.dot_dimension_numbers<[1], [0], [0], [1], [0, 0, 1, 1], [], []>} : vector<8x128xbf16>, vector<128x128xbf16>, vector<8x128xf32> -> vector<8x128xf32>
    %c0_23 = arith.constant 0 : index
    %c0_24 = arith.constant 0 : index
    %51 = vector.load %arg8[%c0_23, %c0_24] : memref<1x128xf32, #tpu.memory_space<vmem>>, vector<1x128xf32>
    %52 = vector.broadcast %51 : vector<1x128xf32> to vector<8x128xf32>
    %53 = arith.addf %50, %52 : vector<8x128xf32>
    %c0_25 = arith.constant 0 : index
    %c0_26 = arith.constant 0 : index
    %54 = vector.load %arg10[%c0_25, %c0_26] : memref<8x128xf32, #tpu.memory_space<vmem>>, vector<8x128xf32>
    tpu.vector_store %arg10[%c0_25, %c0_26], %53 {strides = array<i32>} : memref<8x128xf32, #tpu.memory_space<vmem>>, vector<8x128xf32>,
    return
  }
}

</mosaic_0001>

<bundles_post_ra>
// kernel: tpu_custom_call.1
= control target key start
LH: loop header
LB: loop body
LE: loop exit
PB: predicated region body
PF: predicated region fallthrough
CT: control target
= control target key end

     0   :  { %18 = vsyncpa [#allocation4], 0  ;;  %s1461_s0 = inlined_call_operand.<no memory space> [shape: s32[1], index: 0, kind: input, shape index: {}]   ;;  %s1462_s1 = inlined_call_operand.hbm [shape: f32[8,128], index: 1, kind: input, shape index: {}]   ;;  %s1463_s2 = inlined_call_operand.hbm [shape: f32[8,128], index: 2, kind: input, shape index: {}]   ;;  %s1464_s3 = inlined_call_operand.hbm [shape: bf16[128,384], index: 3, kind: input, shape index: {}]   ;;  %s1465_s4 = inlined_call_operand.hbm [shape: bf16[128,384], index: 4, kind: input, shape index: {}]   ;;  %s1466_s5 = inlined_call_operand.vmem [shape: f32[1,384], index: 5, kind: input, shape index: {}]   ;;  %s1467_s6 = inlined_call_operand.vmem [shape: f32[1,128], index: 6, kind: input, shape index: {}]   ;;  %s1468_s7 = inlined_call_operand.hbm [shape: bf16[128,128], index: 7, kind: input, shape index: {}]   ;;  %s1469_s8 = inlined_call_operand.vmem [shape: f32[1,128], index: 8, kind: input, shape index: {}]   ;;  %s1470_s9 = inlined_call_operand.hbm [shape: f32[8,128], index: 9, kind: output, shape index: {0}]   ;;  %s1471_s10 = inlined_call_operand.hbm [shape: f32[8,128], index: 10, kind: output, shape index: {1}]   ;;  %s1472_s11 = inlined_call_operand.hbm [shape: f32[8,128], index: 11, kind: output, shape index: {2}]  }
   0x1   :  { %19 = vsyncpa [#allocation7], 0 }
   0x2   :  { %20 = vsyncpa [#allocation10], 0 }
   0x3   :  { %21 = vsyncpa [#allocation5], 0 }
   0x4   :  { %22 = vsyncpa [#allocation14], 0  ;;  %s1235_s17 = smov [#allocation6]   ;;  %s1049_s21 = scalar_lea.hbm %s1463_s2, 128 }
   0x5   :  { %s41_s18 = sshll.u32 %s1235_s17, 4  ;;  %p1050_p0 = scmp.ne.s32.totalorder %s1463_s2, %s1049_s21  ;;  %s42_s18 = int_to_ptr.vmem [resolvable:$true] %s41_s18 }
   0x6   :  { %p1053_p1 = scmp.lt.u32.totalorder %s1049_s21, %s1463_s2 }
   0x8   :  { %p1055_p2 = pnand %p1053_p1, %p1050_p0 }
   0xa   :  { %1058 = shalt.err (!%p1055_p2)
}
   0xb   :  { %s1059_s26 = scalar_lea.vmem %s42_s18, 128  ;;  %p1064_p4 = scmp.lt.s32.totalorder %s42_s18, %s42_s18 }
   0xc   :  { %p1060_p3 = scmp.ne.s32.totalorder %s42_s18, %s1059_s26  ;;  %p1065_p5 = scmp.lt.s32.totalorder %s1059_s26, %s1059_s26 }
   0xe   :  { %p1066_p6 = por %p1065_p5, %p1064_p4 }
  0x10   :  { %p1067_p7 = pnand %p1066_p6, %p1060_p3 }
  0x12   :  { %1070 = shalt.err (!%p1067_p7)
}
  0x13   :  { %44 = dma.hbm_to_vmem [thread:$0]  %s1463_s2, 128, %s42_s18, [#allocation7]  }
  0x14   :  { %s1236_s29 = smov [#allocation9]   ;;  %s1237_s12 = smov [#allocation3]  }
  0x15   :  { %s62_s30 = sshll.u32 %s1236_s29, 4  ;;  %s31_s13 = sshll.u32 %s1237_s12, 4  ;;  %s63_s30 = int_to_ptr.vmem [resolvable:$true] %s62_s30  ;;  %s32_s13 = int_to_ptr.vmem [resolvable:$true] %s31_s13 }
  0x16   :  { %s1071_s16 = scalar_lea.hbm %s1465_s4, 3072 }
  0x17   :  { %p1072_p8 = scmp.ne.s32.totalorder %s1465_s4, %s1071_s16  ;;  %p1075_p9 = scmp.lt.u32.totalorder %s1071_s16, %s1465_s4 }
  0x19   :  { %p1077_p10 = pnand %p1075_p9, %p1072_p8 }
  0x1b   :  { %1080 = shalt.err (!%p1077_p10)
}
  0x1c   :  { %s1081_s2 = scalar_lea.vmem %s63_s30, 3072  ;;  %p1086_p12 = scmp.lt.s32.totalorder %s63_s30, %s63_s30 }
  0x1d   :  { %p1082_p11 = scmp.ne.s32.totalorder %s63_s30, %s1081_s2  ;;  %p1087_p13 = scmp.lt.s32.totalorder %s1081_s2, %s1081_s2 }
  0x1f   :  { %p1088_p0 = por %p1087_p13, %p1086_p12 }
  0x21   :  { %p1089_p1 = pnand %p1088_p0, %p1082_p11 }
  0x23   :  { %1092 = shalt.err (!%p1089_p1)
}
  0x24   :  { %s1238_s18 = smov 192   ;;  %s1239_s22 = smov 12  }
  0x25   :  { %68 = dma.hbm_to_vmem [thread:$0]  %s1465_s4, 3072, %s63_s30, [#allocation10], %s1238_s18, %s1238_s18, %s1239_s22  }
  0x26   :  { %s1093_s27 = scalar_lea.hbm %s1462_s1, 128 }
  0x27   :  { %p1094_p2 = scmp.ne.s32.totalorder %s1462_s1, %s1093_s27  ;;  %p1097_p3 = scmp.lt.u32.totalorder %s1093_s27, %s1462_s1 }
  0x29   :  { %p1099_p4 = pnand %p1097_p3, %p1094_p2 }
  0x2b   :  { %1102 = shalt.err (!%p1099_p4)
}
  0x2c   :  { %s1103_s15 = scalar_lea.vmem %s32_s13, 128  ;;  %p1108_p6 = scmp.lt.s32.totalorder %s32_s13, %s32_s13 }
  0x2d   :  { %p1104_p5 = scmp.ne.s32.totalorder %s32_s13, %s1103_s15  ;;  %p1109_p7 = scmp.lt.s32.totalorder %s1103_s15, %s1103_s15 }
  0x2f   :  { %p1110_p8 = por %p1109_p7, %p1108_p6 }
  0x31   :  { %p1111_p9 = pnand %p1110_p8, %p1104_p5 }
  0x33   :  { %1114 = shalt.err (!%p1111_p9)
}
  0x34   :  { %34 = dma.hbm_to_vmem [thread:$0]  %s1462_s1, 128, %s32_s13, [#allocation4]  }
  0x35   :  { %s1240_s16 = smov [#allocation8]   ;;  %s1241_s19 = smov [#allocation11]  }
  0x36   :  { %s50_s17 = sshll.u32 %s1240_s16, 4  ;;  %s78_s20 = sshll.u32 %s1241_s19, 4  ;;  %s51_s17 = int_to_ptr.vmem [resolvable:$true] %s50_s17  ;;  %s79_s20 = int_to_ptr.vmem [resolvable:$true] %s78_s20 }
  0x37   :  { %s1115_s23 = scalar_lea.hbm %s1464_s3, 3072 }
  0x38   :  { %p1116_p10 = scmp.ne.s32.totalorder %s1464_s3, %s1115_s23  ;;  %p1119_p11 = scmp.lt.u32.totalorder %s1115_s23, %s1464_s3 }
  0x3a   :  { %p1121_p12 = pnand %p1119_p11, %p1116_p10 }
  0x3c   :  { %1124 = shalt.err (!%p1121_p12)
}
  0x3d   :  { %s1125_s1 = scalar_lea.vmem %s51_s17, 3072  ;;  %p1130_p0 = scmp.lt.s32.totalorder %s51_s17, %s51_s17 }
  0x3e   :  { %p1126_p13 = scmp.ne.s32.totalorder %s51_s17, %s1125_s1  ;;  %p1131_p1 = scmp.lt.s32.totalorder %s1125_s1, %s1125_s1 }
  0x40   :  { %p1132_p2 = por %p1131_p1, %p1130_p0 }
  0x42   :  { %p1133_p3 = pnand %p1132_p2, %p1126_p13 }
  0x44   :  { %1136 = shalt.err (!%p1133_p3)
}
  0x45   :  { %56 = dma.hbm_to_vmem [thread:$0]  %s1464_s3, 3072, %s51_s17, [#allocation7], %s1238_s18, %s1238_s18, %s1239_s22  }
  0x46   :  { %s1137_s14 = scalar_lea.hbm %s1468_s7, 1024 }
  0x47   :  { %p1138_p4 = scmp.ne.s32.totalorder %s1468_s7, %s1137_s14  ;;  %p1141_p5 = scmp.lt.u32.totalorder %s1137_s14, %s1468_s7 }
  0x49   :  { %p1143_p6 = pnand %p1141_p5, %p1138_p4 }
  0x4b   :  { %1146 = shalt.err (!%p1143_p6)
}
  0x4c   :  { %s1147_s19 = scalar_lea.vmem %s79_s20, 1024  ;;  %p1152_p8 = scmp.lt.s32.totalorder %s79_s20, %s79_s20 }
  0x4d   :  { %p1148_p7 = scmp.ne.s32.totalorder %s79_s20, %s1147_s19  ;;  %p1153_p9 = scmp.lt.s32.totalorder %s1147_s19, %s1147_s19 }
  0x4f   :  { %p1154_p10 = por %p1153_p9, %p1152_p8 }
  0x51   :  { %p1155_p11 = pnand %p1154_p10, %p1148_p7 }
  0x53   :  { %1158 = shalt.err (!%p1155_p11)
}
  0x54   :  { %s1242_s3 = smov 64   ;;  %s1243_s18 = smov 4  }
  0x55   :  { %84 = dma.hbm_to_vmem [thread:$0]  %s1468_s7, 1024, %s79_s20, [#allocation10], %s1242_s3, %s1242_s3, %s1243_s18  }
  0x56   :  { %1225 = dma.done.wait [#allocation4], 128  }
  0x57   :  { %1226 = vsyncadd [#allocation4], 4294967168 }
  0x58   :  { %1227 = dma.done.wait [#allocation7], 3200  }
  0x59   :  { %1228 = vsyncadd [#allocation7], 4294964096 }
  0x5a   :  { %1229 = dma.done.wait [#allocation10], 4096  }
  0x5b   :  { %1230 = vsyncadd [#allocation10], 4294963200  ;;  %v1244_v0 = vmov 0.0   ;;  %v1245_v1 = vmov 0   ;;  %vm1246_vm0 = vmmov 0   ;;  %v158_v23 = vld [vmem:[#allocation3] sm:$0xff] }
  0x5c   :  { %886 = vmatprep.subr.bf16.mxu1 %v1244_v0  ;;  %369 = vmatprep.mubr.bf16.mxu0 %v1245_v1  ;;  %v967_v2 = vld [vmem:[#allocation8 + $0x4] ss:$12 sps:$4 sm:$0xff]   ;;  %v969_v3 = vld [vmem:[#allocation8] ss:$12 sps:$4 sm:$0xff]   ;;  %v970_v4 = vld [vmem:[#allocation8 + $0x1c] ss:$12 sps:$4 sm:$0xff]   ;;  %v159_v26 = vpack.c.bf16 %v158_v23, %v158_v23 }
  0x5d   :  { %902 = vmatprep.mubr.msk.bf16.mxu1 %vm1246_vm0, %v1244_v0  ;;  %337 = vmatprep.subr.bf16.mxu0 %v967_v2  ;;  %v972_v5 = vld [vmem:[#allocation8 + $0x18] ss:$12 sps:$4 sm:$0xff]   ;;  %v973_v6 = vld [vmem:[#allocation8 + $0x34] ss:$12 sps:$4 sm:$0xff]   ;;  %v975_v7 = vld [vmem:[#allocation8 + $0x30] ss:$12 sps:$4 sm:$0xff]  }
  0x5e   :  { %338 = vmatpush1.bf16.msra.mxu0 %v969_v3  ;;  %v976_v8 = vld [vmem:[#allocation8 + $0x4c] ss:$12 sps:$4 sm:$0xff]   ;;  %v987_v9 = vld [vmem:[#allocation8 + $0x8] ss:$12 sps:$4 sm:$0xff]   ;;  %v979_v11 = vld [vmem:[#allocation8 + $0x64] ss:$12 sps:$4 sm:$0xff]  }
  0x5f   :  { %339 = vmatprep.subr.bf16.mxu0 %v970_v4  ;;  %v978_v10 = vld [vmem:[#allocation8 + $0x48] ss:$12 sps:$4 sm:$0xff]   ;;  %887 = vmatpush3.bf16.msra.mxu1 %v987_v9  ;;  %v991_v12 = vld [vmem:[#allocation8 + $0x20] ss:$12 sps:$4 sm:$0xff]   ;;  %v993_v14 = vld [vmem:[#allocation8 + $0x38] ss:$12 sps:$4 sm:$0xff]  }
  0x60   :  { %888 = vmatprep.subr.bf16.mxu1 %v1244_v0  ;;  %v981_v13 = vld [vmem:[#allocation8 + $0x60] ss:$12 sps:$4 sm:$0xff]   ;;  %v982_v15 = vld [vmem:[#allocation8 + $0x7c] ss:$12 sps:$4 sm:$0xff]   ;;  %v984_v16 = vld [vmem:[#allocation8 + $0x78] ss:$12 sps:$4 sm:$0xff]  }
  0x61   :  { %v997_v17 = vld [vmem:[#allocation8 + $0x50] ss:$12 sps:$4 sm:$0xff]   ;;  %v985_v18 = vld [vmem:[#allocation8 + $0x94] ss:$12 sps:$4 sm:$0xff]   ;;  %v989_v21 = vld [vmem:[#allocation8 + $0xac] ss:$12 sps:$4 sm:$0xff]  }
  0x62   :  { %340 = vmatpush1.bf16.msra.mxu0 %v972_v5  ;;  %v988_v19 = vld [vmem:[#allocation8 + $0x90] ss:$12 sps:$4 sm:$0xff]   ;;  %v1001_v20 = vld [vmem:[#allocation8 + $0x68] ss:$12 sps:$4 sm:$0xff]   ;;  %v1005_v24 = vld [vmem:[#allocation8 + $0x80] ss:$12 sps:$4 sm:$0xff]   ;;  %v194_v5 = vlaneseq }
  0x63   :  { %341 = vmatprep.subr.bf16.mxu0 %v973_v6  ;;  %889 = vmatpush3.bf16.msra.mxu1 %v991_v12  ;;  %v992_v22 = vld [vmem:[#allocation8 + $0xa8] ss:$12 sps:$4 sm:$0xff]   ;;  %v996_v25 = vld [vmem:[#allocation9 + $0x4] ss:$12 sps:$4 sm:$0xff]   ;;  %v994_v27 = vld [vmem:[#allocation9] ss:$12 sps:$4 sm:$0xff]  }
  0x64   :  { %890 = vmatprep.subr.bf16.mxu1 %v1244_v0  ;;  %v1009_v28 = vld [vmem:[#allocation8 + $0x98] ss:$12 sps:$4 sm:$0xff]   ;;  %v1000_v29 = vld [vmem:[#allocation9 + $0x1c] ss:$12 sps:$4 sm:$0xff]   ;;  %v1004_v32 = vld [vmem:[#allocation9 + $0x34] ss:$12 sps:$4 sm:$0xff]  }
  0x65   :  { %v998_v30 = vld [vmem:[#allocation9 + $0x18] ss:$12 sps:$4 sm:$0xff]   ;;  %v1013_v31 = vld [vmem:[#allocation8 + $0xb0] ss:$12 sps:$4 sm:$0xff]   ;;  %v1020_v35 = vld [vmem:[#allocation9 + $0x8] ss:$12 sps:$4 sm:$0xff]  }
  0x66   :  { %342 = vmatpush1.bf16.msra.mxu0 %v975_v7  ;;  %v1002_v33 = vld [vmem:[#allocation9 + $0x30] ss:$12 sps:$4 sm:$0xff]   ;;  %v1008_v34 = vld [vmem:[#allocation9 + $0x4c] ss:$12 sps:$4 sm:$0xff]   ;;  %v1006_v36 = vld [vmem:[#allocation9 + $0x48] ss:$12 sps:$4 sm:$0xff]  }
  0x67   :  { %343 = vmatprep.subr.bf16.mxu0 %v976_v8  ;;  %891 = vmatpush3.bf16.msra.mxu1 %v993_v14  ;;  %v1024_v37 = vld [vmem:[#allocation9 + $0x20] ss:$12 sps:$4 sm:$0xff]   ;;  %v1012_v38 = vld [vmem:[#allocation9 + $0x64] ss:$12 sps:$4 sm:$0xff]   ;;  %v1016_v41 = vld [vmem:[#allocation9 + $0x7c] ss:$12 sps:$4 sm:$0xff]  }
  0x68   :  { %892 = vmatprep.subr.bf16.mxu1 %v1244_v0  ;;  %v1010_v39 = vld [vmem:[#allocation9 + $0x60] ss:$12 sps:$4 sm:$0xff]   ;;  %v1025_v40 = vld [vmem:[#allocation9 + $0x38] ss:$12 sps:$4 sm:$0xff]   ;;  %s419_s21 = ssub.s32 1, %s1461_s0  ;;  %v1033_v58 = vld [vmem:[#allocation11 + $0x10] sm:$0xff]  }
  0x69   :  { %v1014_v42 = vld [vmem:[#allocation9 + $0x78] ss:$12 sps:$4 sm:$0xff]   ;;  %s420_s2 = scvt.s32.f32 %s419_s21  ;;  %v1026_v43 = vld [vmem:[#allocation9 + $0x50] ss:$12 sps:$4 sm:$0xff]   ;;  %v1019_v44 = vld [vmem:[#allocation9 + $0x94] ss:$12 sps:$4 sm:$0xff]  }
  0x6a   :  { %344 = vmatpush1.bf16.msra.mxu0 %v978_v10  ;;  %v1017_v45 = vld [vmem:[#allocation9 + $0x90] ss:$12 sps:$4 sm:$0xff]   ;;  %v1027_v48 = vld [vmem:[#allocation9 + $0x68] ss:$12 sps:$4 sm:$0xff]   ;;  %v1023_v49 = vld [vmem:[#allocation9 + $0xac] ss:$12 sps:$4 sm:$0xff]  }
  0x6b   :  { %345 = vmatprep.subr.bf16.mxu0 %v979_v11  ;;  %893 = vmatpush3.bf16.msra.mxu1 %v997_v17  ;;  %v421_v46 = vld [vmem:[#allocation6] sm:$0xff]  ;;  %v422_v47 = vstv %s420_s2  ;;  %v1021_v51 = vld [vmem:[#allocation9 + $0xa8] ss:$12 sps:$4 sm:$0xff]   ;;  %v1028_v52 = vld [vmem:[#allocation9 + $0x80] ss:$12 sps:$4 sm:$0xff]   ;;  %v195_v6 = vshrl.u32 %v194_v5, 7 }
  0x6c   :  { %894 = vmatprep.subr.bf16.mxu1 %v1244_v0  ;;  %v1398_v50 = vmul.f32 %v422_v47, %v421_v46  ;;  %v1029_v54 = vld [vmem:[#allocation9 + $0x98] ss:$12 sps:$4 sm:$0xff]   ;;  %v1030_v55 = vld [vmem:[#allocation9 + $0xb0] ss:$12 sps:$4 sm:$0xff]   ;;  %v1032_v57 = vld [vmem:[#allocation11 + $0x8] sm:$0xff]  }
  0x6d   :  { %v1031_v56 = vld [vmem:[#allocation11] sm:$0xff]   ;;  %v1034_v59 = vld [vmem:[#allocation11 + $0x18] sm:$0xff]   ;;  %v1036_v61 = vld [vmem:[#allocation11 + $0x28] sm:$0xff]   ;;  %v196_v7 = vsub.s32 0, %v195_v6  ;;  %v200_v9 = vsub.s32 1, %v195_v6 }
  0x6e   :  { %346 = vmatpush1.bf16.msra.mxu0 %v981_v13  ;;  %v424_v53 = vpack.c.bf16 %v1398_v50, %v1398_v50  ;;  %v1035_v60 = vld [vmem:[#allocation11 + $0x20] sm:$0xff]   ;;  %v1037_v62 = vld [vmem:[#allocation11 + $0x30] sm:$0xff]   ;;  %v1038_v63 = vld [vmem:[#allocation11 + $0x38] sm:$0xff]  }
  0x6f   :  { %347 = vmatprep.subr.bf16.mxu0 %v982_v15  ;;  %895 = vmatpush3.bf16.msra.mxu1 %v1001_v20  ;;  %v192_v8 = vld [vmem:[%s1466_s5] sm:$0x7] }
  0x70   :  { %896 = vmatprep.subr.bf16.mxu1 %v1244_v0  ;;  %v197_v10 = vrot.slane %v192_v8, %v196_v7  ;;  %v201_v12 = vrot.slane %v192_v8, %v200_v9 }
  0x72   :  { %348 = vmatpush1.bf16.msra.mxu0 %v984_v16 }
  0x73   :  { %349 = vmatprep.subr.bf16.mxu0 %v985_v18  ;;  %897 = vmatpush3.bf16.msra.mxu1 %v1005_v24 }
  0x74   :  { %898 = vmatprep.subr.bf16.mxu1 %v1244_v0 }
  0x76   :  { %350 = vmatpush1.bf16.msra.mxu0 %v988_v19 }
  0x77   :  { %351 = vmatprep.subr.bf16.mxu0 %v989_v21  ;;  %899 = vmatpush3.bf16.msra.mxu1 %v1009_v28 }
  0x78   :  { %900 = vmatprep.subr.bf16.mxu1 %v1244_v0 }
  0x7a   :  { %352 = vmatpush1.bf16.msra.mxu0 %v992_v22 }
  0x7b   :  { %553 = vmatprep.subr.bf16.mxu0 %v996_v25  ;;  %901 = vmatpush3.bf16.msra.mxu1 %v1013_v31  ;;  %v204_v25 = vsub.s32 2, %v195_v6 }
  0x7c   :  { %906 = vmatprep.subr.bf16.mxu1 %v1244_v0 }
  0x7d   :  { %370 = vmatmul.mubr.bf16.vlgmr.msra.gmra.mrb[0].mxu0 %v159_v26  ;;  %v205_v28 = vrot.slane %v192_v8, %v204_v25 }
  0x7e   :  { %554 = vmatpush1.bf16.msra.mxu0 %v994_v27  ;;  %585 = vmatprep.mubr.bf16.mxu0 %v1245_v1  ;;  %v799_v27 = vld [vmem:[%s1467_s6] ss:$0 sm:$0xff]  ;;  %s1247_s6 = smov [#allocation12]  }
  0x7f   :  { %555 = vmatprep.subr.bf16.mxu0 %v1000_v29  ;;  %903 = vmatmul.mubr.bf16.vlgmr.msra.gmra.mrb[0].mxu1 %v159_v26  ;;  %s761_s25 = sshll.u32 %s1247_s6, 4  ;;  %s762_s25 = int_to_ptr.vmem [resolvable:$true] %s761_s25 }
  0x80   :  { %907 = vmatpush3.bf16.msra.mxu1 %v1020_v35  ;;  %922 = vmatprep.mubr.msk.bf16.mxu1 %vm1246_vm0, %v1244_v0  ;;  %s1159_s26 = scalar_lea.vmem %s762_s25, 128  ;;  %p1164_p13 = scmp.lt.s32.totalorder %s762_s25, %s762_s25 }
  0x81   :  { %908 = vmatprep.subr.bf16.mxu1 %v1244_v0  ;;  %p1160_p12 = scmp.ne.s32.totalorder %s762_s25, %s1159_s26  ;;  %p1165_p0 = scmp.lt.s32.totalorder %s1159_s26, %s1159_s26 }
  0x82   :  { %556 = vmatpush1.bf16.msra.mxu0 %v998_v30 }
  0x83   :  { %557 = vmatprep.subr.bf16.mxu0 %v1004_v32  ;;  %p1166_p1 = por %p1165_p0, %p1164_p13 }
  0x84   :  { %909 = vmatpush3.bf16.msra.mxu1 %v1024_v37 }
  0x85   :  { %910 = vmatprep.subr.bf16.mxu1 %v1244_v0  ;;  %p1167_p2 = pnand %p1166_p1, %p1160_p12 }
  0x86   :  { %558 = vmatpush1.bf16.msra.mxu0 %v1002_v33 }
  0x87   :  { %559 = vmatprep.subr.bf16.mxu0 %v1008_v34 }
  0x88   :  { %911 = vmatpush3.bf16.msra.mxu1 %v1025_v40 }
  0x89   :  { %912 = vmatprep.subr.bf16.mxu1 %v1244_v0 }
  0x8a   :  { %560 = vmatpush1.bf16.msra.mxu0 %v1006_v36 }
  0x8b   :  { %561 = vmatprep.subr.bf16.mxu0 %v1012_v38 }
  0x8c   :  { %913 = vmatpush3.bf16.msra.mxu1 %v1026_v43 }
  0x8d   :  { %914 = vmatprep.subr.bf16.mxu1 %v1244_v0 }
  0x8e   :  { %562 = vmatpush1.bf16.msra.mxu0 %v1010_v39 }
  0x8f   :  { %563 = vmatprep.subr.bf16.mxu0 %v1016_v41 }
  0x90   :  { %915 = vmatpush3.bf16.msra.mxu1 %v1027_v48 }
  0x91   :  { %916 = vmatprep.subr.bf16.mxu1 %v1244_v0 }
  0x92   :  { %564 = vmatpush1.bf16.msra.mxu0 %v1014_v42 }
  0x93   :  { %565 = vmatprep.subr.bf16.mxu0 %v1019_v44 }
  0x94   :  { %917 = vmatpush3.bf16.msra.mxu1 %v1028_v52 }
  0x95   :  { %918 = vmatprep.subr.bf16.mxu1 %v1244_v0 }
  0x96   :  { %566 = vmatpush1.bf16.msra.mxu0 %v1017_v45 }
  0x97   :  { %567 = vmatprep.subr.bf16.mxu0 %v1023_v49 }
  0x98   :  { %919 = vmatpush3.bf16.msra.mxu1 %v1029_v54 }
  0x99   :  { %920 = vmatprep.subr.bf16.mxu1 %v1244_v0 }
  0x9a   :  { %568 = vmatpush1.bf16.msra.mxu0 %v1021_v51 }
  0x9b   :  { %926 = vmatprep.subr.bf16.mxu0 %v1244_v0 }
  0x9c   :  { %921 = vmatpush3.bf16.msra.mxu1 %v1030_v55 }
  0x9d   :  { %586 = vmatmul.mubr.bf16.vlgmr.msra.gmra.mrb[0].mxu0 %v424_v53 }
  0x9e   :  { %942 = vmatprep.mubr.msk.bf16.mxu0 %vm1246_vm0, %v1244_v0  ;;  %927 = vmatpush3.bf16.msra.mxu0 %v1031_v56 }
  0x9f   :  { %923 = vmatmul.mubr.bf16.vlgmr.msra.gmra.mrb[4].mxu1 %v424_v53  ;;  %928 = vmatprep.subr.bf16.mxu0 %v1244_v0 }
  0xa2   :  { %929 = vmatpush3.bf16.msra.mxu0 %v1032_v57 }
  0xa3   :  { %930 = vmatprep.subr.bf16.mxu0 %v1244_v0 }
  0xa6   :  { %931 = vmatpush3.bf16.msra.mxu0 %v1033_v58 }
  0xa7   :  { %932 = vmatprep.subr.bf16.mxu0 %v1244_v0 }
  0xaa   :  { %933 = vmatpush3.bf16.msra.mxu0 %v1034_v59 }
  0xab   :  { %934 = vmatprep.subr.bf16.mxu0 %v1244_v0 }
  0xae   :  { %935 = vmatpush3.bf16.msra.mxu0 %v1035_v60 }
  0xaf   :  { %936 = vmatprep.subr.bf16.mxu0 %v1244_v0 }
  0xb2   :  { %937 = vmatpush3.bf16.msra.mxu0 %v1036_v61 }
  0xb3   :  { %938 = vmatprep.subr.bf16.mxu0 %v1244_v0 }
  0xb6   :  { %939 = vmatpush3.bf16.msra.mxu0 %v1037_v62 }
  0xb7   :  { %940 = vmatprep.subr.bf16.mxu0 %v1244_v0 }
  0xba   :  { %941 = vmatpush3.bf16.msra.mxu0 %v1038_v63 }
 0x152   :  { %v412_v1 = vpop.f32.mrb[0].mxu1 }
 0x153   :  { %v904_v2 = vpop.f32.mrb[1].mxu1  ;;  %v413_v32 = vadd.f32 %v412_v1, %v205_v28 }
 0x154   :  { %v415_v3 = vpop.f32.mrb[2].mxu1 }
 0x155   :  { %v905_v4 = vpop.f32.mrb[3].mxu1 }
 0x170   :  { %v587_v11 = vpop.f32.mrb[0].mxu0 }
 0x171   :  { %v946_v13 = vadd.f32 %v587_v11, %v197_v10  ;;  %v589_v14 = vpop.f32.mrb[1].mxu0 }
 0x172   :  { %v591_v15 = vpop.f32.mrb[2].mxu0  ;;  %v947_v17 = vadd.f32 %v589_v14, %v201_v12  ;;  %v628_v19 = vpop.f32.mrb[4].mxu1 }
 0x173   :  { %v848_v0 = vmul.f32 -1.442695, %v946_v13  ;;  %v592_v16 = vpop.f32.mrb[3].mxu0  ;;  %v924_v20 = vpop.f32.mrb[5].mxu1  ;;  %v648_v30 = vadd.f32 %v799_v27, %v628_v19 }
 0x174   :  { %v849_v18 = vmul.f32 -1.442695, %v947_v17  ;;  %v631_v21 = vpop.f32.mrb[6].mxu1 }
 0x175   :  { %1039 = vpow2.f32 %v848_v0  ;;  %v925_v22 = vpop.f32.mrb[7].mxu1 }
 0x176   :  { %1041 = vpow2.f32 %v849_v18 }
 0x17f   :  { %v1040_v23 = vpop.eup %1039 }
 0x180   :  { %v638_v24 = vadd.f32 1.0, %v1040_v23  ;;  %v1042_v26 = vpop.eup %1041 }
 0x181   :  { %v645_v29 = vadd.f32 1.0, %v1042_v26 }
 0x182   :  { %1043 = vrcp.f32 %v638_v24 }
 0x183   :  { %1045 = vrcp.f32 %v645_v29 }
 0x18c   :  { %v1044_v31 = vpop.eup %1043 }
 0x18d   :  { %v649_v33 = vmul.f32 %v1044_v31, %v648_v30  ;;  %v1046_v35 = vpop.eup %1045 }
 0x18e   :  { %v652_v36 = vsub.f32 1.0, %v1046_v35  ;;  %v654_v39 = vmul.f32 %v1046_v35, %v1398_v50 }
 0x18f   :  { %v650_v34 = vadd.f32 %v649_v33, %v413_v32 }
 0x191   :  { %1047 = vtanh.f32 %v650_v34 }
 0x19b   :  { %v1048_v37 = vpop.eup %1047 }
 0x19c   :  { %v653_v38 = vmul.f32 %v1048_v37, %v652_v36 }
 0x19e   :  { %v655_v40 = vadd.f32 %v654_v39, %v653_v38 }
 0x1a0   :  { %v658_v41 = vpack.c.bf16 %v655_v40, %v655_v40  ;;  %656 = vst [vmem:[#allocation12] sm:$0xff] %v655_v40  ;;  %657 = vst [vmem:[#allocation15] sm:$0xff] %v655_v40 }
 0x1a2   :  { %943 = vmatmul.mubr.bf16.vlgmr.msra.gmra.mrb[4].mxu0 %v658_v41 }
 0x1a3   :  { %1170 = shalt.err (!%p1167_p2)
}
 0x1a4   :  { %s1171_s13 = scalar_lea.hbm %s1470_s9, 128 }
 0x1a5   :  { %p1172_p3 = scmp.ne.s32.totalorder %s1470_s9, %s1171_s13  ;;  %p1175_p4 = scmp.lt.u32.totalorder %s1171_s13, %s1470_s9 }
 0x1a7   :  { %p1177_p5 = pnand %p1175_p4, %p1172_p3 }
 0x1a9   :  { %1180 = shalt.err (!%p1177_p5)
}
 0x1aa   :  { %764 = dma.vmem_to_hbm [thread:$0]  %s762_s25, 128, %s1470_s9, [#allocation5]   ;;  %v850_v42 = vld [vmem:[%s1469_s8] ss:$0 sm:$0xff] }
 0x1ab   :  { %s1248_s19 = smov [#allocation13]   ;;  %s1249_s18 = smov [#allocation15]  }
 0x1ac   :  { %s771_s3 = sshll.u32 %s1248_s19, 4  ;;  %s781_s22 = sshll.u32 %s1249_s18, 4  ;;  %s772_s3 = int_to_ptr.vmem [resolvable:$true] %s771_s3  ;;  %s782_s22 = int_to_ptr.vmem [resolvable:$true] %s781_s22 }
 0x1ad   :  { %s1181_s17 = scalar_lea.vmem %s772_s3, 128  ;;  %p1186_p7 = scmp.lt.s32.totalorder %s772_s3, %s772_s3 }
 0x1ae   :  { %p1182_p6 = scmp.ne.s32.totalorder %s772_s3, %s1181_s17  ;;  %p1187_p8 = scmp.lt.s32.totalorder %s1181_s17, %s1181_s17 }
 0x1b0   :  { %p1188_p9 = por %p1187_p8, %p1186_p7 }
 0x1b2   :  { %p1189_p10 = pnand %p1188_p9, %p1182_p6 }
 0x275   :  { %v748_v43 = vpop.f32.mrb[4].mxu0 }
 0x276   :  { %v749_v44 = vadd.f32 %v850_v42, %v748_v43  ;;  %v944_v45 = vpop.f32.mrb[5].mxu0 }
 0x277   :  { %v751_v46 = vpop.f32.mrb[6].mxu0 }
 0x278   :  { %754 = vst [vmem:[#allocation13] sm:$0xff] %v749_v44  ;;  %v945_v47 = vpop.f32.mrb[7].mxu0 }
 0x279   :  { %1192 = shalt.err (!%p1189_p10)
}
 0x27a   :  { %s1193_s7 = scalar_lea.hbm %s1471_s10, 128 }
 0x27b   :  { %p1194_p11 = scmp.ne.s32.totalorder %s1471_s10, %s1193_s7  ;;  %p1197_p12 = scmp.lt.u32.totalorder %s1193_s7, %s1471_s10 }
 0x27d   :  { %p1199_p13 = pnand %p1197_p12, %p1194_p11 }
 0x27f   :  { %1202 = shalt.err (!%p1199_p13)
}
 0x280   :  { %774 = dma.vmem_to_hbm [thread:$0]  %s772_s3, 128, %s1471_s10, [#allocation14]  }
 0x281   :  { %s1203_s24 = scalar_lea.vmem %s782_s22, 128  ;;  %p1208_p1 = scmp.lt.s32.totalorder %s782_s22, %s782_s22 }
 0x282   :  { %p1204_p0 = scmp.ne.s32.totalorder %s782_s22, %s1203_s24  ;;  %p1209_p2 = scmp.lt.s32.totalorder %s1203_s24, %s1203_s24 }
 0x284   :  { %p1210_p3 = por %p1209_p2, %p1208_p1 }
 0x286   :  { %p1211_p4 = pnand %p1210_p3, %p1204_p0 }
 0x288   :  { %1214 = shalt.err (!%p1211_p4)
}
 0x289   :  { %s1215_s26 = scalar_lea.hbm %s1472_s11, 128 }
 0x28a   :  { %p1216_p5 = scmp.ne.s32.totalorder %s1472_s11, %s1215_s26  ;;  %p1219_p6 = scmp.lt.u32.totalorder %s1215_s26, %s1472_s11 }
 0x28c   :  { %p1221_p7 = pnand %p1219_p6, %p1216_p5 }
 0x28e   :  { %1224 = shalt.err (!%p1221_p7)
}
 0x28f   :  { %784 = dma.vmem_to_hbm [thread:$0]  %s782_s22, 128, %s1472_s11, [#allocation14]  }
 0x290   :  { %1231 = dma.done.wait [#allocation5], 128  }
 0x291   :  { %1232 = vsyncadd [#allocation5], 4294967168 }
 0x292   :  { %1233 = dma.done.wait [#allocation14], 256  }
 0x293   :  { %1234 = vsyncadd [#allocation14], 4294967040 }
 0x294   :  { %794 = vsyncpa [#allocation4], 1 }
 0x295   :  { %795 = vsyncpa [#allocation7], 1 }
 0x296   :  { %796 = vsyncpa [#allocation10], 1 }
 0x297   :  { %797 = vsyncpa [#allocation5], 1 }
 0x298   :  { %798 = vsyncpa [#allocation14], 1 }

</bundles_post_ra>
